<compile_context>
chip_gen: v5e
topology: v5e:2x2
jax: 0.10.0
libtpu: 0.0.40
codegen_flags: <defaults>
</compile_context>

<pallas_src>
import jax
import jax.numpy as jnp
from jax.experimental import pallas as pl
from jax.experimental.pallas import tpu as pltpu


def _round_up(n, m):
    return ((n + m - 1) // m) * m


def _resmlp_kernel(x_ref, w1_ref, b1_ref, w2_ref, b2_ref, o_ref, acc_ref):
    """Grid = (row tiles, hidden-dim chunks). acc_ref is an f32 accumulator."""
    k = pl.program_id(1)

    x = x_ref[...]                                        # (tm, C) f32

    @pl.when(k == 0)
    def _init():
        # Fold the residual and the second bias into the accumulator init.
        acc_ref[...] = x + b2_ref[...]

    # First linear for hidden chunk k (+ bias, ReLU). bf16 operands, f32 accum.
    h = jnp.dot(x.astype(jnp.bfloat16), w1_ref[...],
                preferred_element_type=jnp.float32)       # (tm, tk)
    h = jnp.maximum(h + b1_ref[...], 0.0)

    # Second linear: accumulate this hidden chunk's contribution in f32.
    acc_ref[...] += jnp.dot(h.astype(jnp.bfloat16), w2_ref[...],
                            preferred_element_type=jnp.float32)

    @pl.when(k == pl.num_programs(1) - 1)
    def _finalize():
        o_ref[...] = acc_ref[...].astype(o_ref.dtype)


def _build_specs(tm, tk, c_pad, nk, single_buffer_consts):
    # Single-buffer blocks whose index_map never changes (weights only when
    # there is a single hidden chunk; b2 always).
    kw_const = {"pipeline_mode": pl.Buffered(1)} if single_buffer_consts else {}
    kw_w = kw_const if nk == 1 else {}
    in_specs = [
        pl.BlockSpec((tm, c_pad), lambda i, k: (i, 0)),               # x tile
        pl.BlockSpec((c_pad, tk), lambda i, k: (0, k), **kw_w),       # W1 cols
        pl.BlockSpec((1, tk), lambda i, k: (0, k), **kw_w),           # b1 chunk
        pl.BlockSpec((tk, c_pad), lambda i, k: (k, 0), **kw_w),       # W2 rows
        pl.BlockSpec((1, c_pad), lambda i, k: (0, 0), **kw_const),    # b2
    ]
    out_specs = pl.BlockSpec((tm, c_pad), lambda i, k: (i, 0))
    return in_specs, out_specs


def resmlp_forward(x, w1, b1, w2, b2, *, tm=256,
                   weight_chunk_budget_bytes=32 << 20):
    """ResMLP forward: relu(x @ w1 + b1) @ w2 + b2 + x.

    x: [N, C]. w1, w2: [C, C] in [in, out] layout (PyTorch weight.T).
    b1, b2: [C]. Returns [N, C] in x.dtype.
    """
    N, C = x.shape
    out_dtype = x.dtype

    # ---- pad to TPU-friendly shapes: lanes multiple of 128, rows to tile size
    c_pad = max(128, _round_up(C, 128))
    sub = {4: 8, 2: 16, 1: 32}.get(jnp.dtype(out_dtype).itemsize, 8)
    tm_eff = min(_round_up(tm, sub), _round_up(N, sub))
    n_pad = _round_up(N, tm_eff)

    x_p = jnp.pad(x.astype(jnp.float32), ((0, n_pad - N), (0, c_pad - C)))
    w1_p = jnp.pad(w1, ((0, c_pad - C), (0, c_pad - C))).astype(jnp.bfloat16)
    w2_p = jnp.pad(w2, ((0, c_pad - C), (0, c_pad - C))).astype(jnp.bfloat16)
    b1_p = jnp.pad(b1.astype(jnp.float32), (0, c_pad - C)).reshape(1, c_pad)
    b2_p = jnp.pad(b2.astype(jnp.float32), (0, c_pad - C)).reshape(1, c_pad)

    # ---- hidden-dim chunking so weight working set stays within VMEM budget
    tk = c_pad
    while (2 * 2 * c_pad * tk * 2) > weight_chunk_budget_bytes:
        half = tk // 2
        if half % 128 == 0 and c_pad % half == 0:
            tk = half
        else:
            break
    nk = c_pad // tk
    grid = (n_pad // tm_eff, nk)

    # ---- VMEM budget hint (double-buffered x/out, f32 acc, bf16 weight chunks)
    w_bufs = 1 if nk == 1 else 2
    vmem_est = (4 * tm_eff * c_pad * 4            # x + out (2 buffers each)
                + tm_eff * c_pad * 4              # f32 accumulator scratch
                + tm_eff * tk * 4                 # h temporary
                + w_bufs * 2 * c_pad * tk * 2     # W1 + W2 chunks (bf16)
                + 4 * c_pad * 4)                  # biases
    vmem_limit = int(min(max(vmem_est * 3 // 2 + (8 << 20), 32 << 20), 64 << 20))

    cost = pl.CostEstimate(
        flops=4 * N * C * C,
        transcendentals=0,
        bytes_accessed=2 * N * C * 4 + 2 * C * C * 2 + 2 * C * 4,
    )

    def _call(single_buffer_consts):
        in_specs, out_specs = _build_specs(tm_eff, tk, c_pad, nk,
                                           single_buffer_consts)
        return pl.pallas_call(
            _resmlp_kernel,
            out_shape=jax.ShapeDtypeStruct((n_pad, c_pad), out_dtype),
            grid_spec=pltpu.PrefetchScalarGridSpec(
                num_scalar_prefetch=0,
                grid=grid,
                in_specs=in_specs,
                out_specs=out_specs,
                scratch_shapes=[pltpu.VMEM((tm_eff, c_pad), jnp.float32)],
            ),
            compiler_params=pltpu.CompilerParams(
                dimension_semantics=("parallel", "arbitrary"),
                vmem_limit_bytes=vmem_limit),
            cost_estimate=cost,
        )(x_p, w1_p, b1_p, w2_p, b2_p)

    try:
        out_p = _call(single_buffer_consts=True)
    except Exception:
        # Fallback if single-buffered (Buffered(1)) constant blocks are rejected.
        out_p = _call(single_buffer_consts=False)

    return out_p[:N, :C]


def init_resmlp_params(key, in_channels, dtype=jnp.float32):
    """nn.Linear default init (uniform +/- 1/sqrt(fan_in)), weights as [in, out]."""
    k1, k2, k3, k4 = jax.random.split(key, 4)
    bound = 1.0 / jnp.sqrt(in_channels)
    w1_t = jax.random.uniform(k1, (in_channels, in_channels), dtype,
                              minval=-bound, maxval=bound)   # = W1^T
    b1 = jax.random.uniform(k2, (in_channels,), dtype, minval=-bound, maxval=bound)
    w2_t = jax.random.uniform(k3, (in_channels, in_channels), dtype,
                              minval=-bound, maxval=bound)   # = W2^T
    b2 = jax.random.uniform(k4, (in_channels,), dtype, minval=-bound, maxval=bound)
    return w1_t, b1, w2_t, b2


if __name__ == "__main__":
    key = jax.random.PRNGKey(0)
    kx, kp = jax.random.split(key)

    N, C = 16, 32  # small demo shapes; kernel pads lanes to 128 internally
    x = jax.random.normal(kx, (N, C), jnp.float32)
    w1_t, b1, w2_t, b2 = init_resmlp_params(kp, C)

    out = resmlp_forward(x, w1_t, b1, w2_t, b2, tm=256)
    out = jax.block_until_ready(out)

    # Reference with the same rounding points as the kernel (bf16 MXU operands,
    # f32 accumulation, f32 bias/residual adds).
    xb = x.astype(jnp.bfloat16).astype(jnp.float32)
    w1b = w1_t.astype(jnp.bfloat16).astype(jnp.float32)
    w2b = w2_t.astype(jnp.bfloat16).astype(jnp.float32)
    h = jnp.maximum(xb @ w1b + b1, 0.0)
    ref_bf16 = h.astype(jnp.bfloat16).astype(jnp.float32) @ w2b + b2 + x

    # Pure-f32 module reference (loose tolerance: bf16 MXU operands).
    ref_f32 = jnp.maximum(x @ w1_t + b1, 0.0) @ w2_t + b2 + x

    assert out.shape == (N, C)
    assert jnp.allclose(out, ref_bf16, atol=2e-3, rtol=2e-3)
    assert jnp.allclose(out, ref_f32, atol=1e-1, rtol=1e-1)

    print("KERNEL_OK")
</pallas_src>

<mosaic_0001>
module attributes {stable_mosaic.version = 11 : i64} {
  func.func @_resmlp_kernel(%arg0: i32, %arg1: i32, %arg2: memref<16x128xf32, #tpu.memory_space<vmem>>, %arg3: memref<128x128xbf16, #tpu.memory_space<vmem>>, %arg4: memref<1x128xf32, #tpu.memory_space<vmem>>, %arg5: memref<128x128xbf16, #tpu.memory_space<vmem>>, %arg6: memref<1x128xf32, #tpu.memory_space<vmem>>, %arg7: memref<16x128xf32, #tpu.memory_space<vmem>>, %arg8: memref<16x128xf32, #tpu.memory_space<vmem>>) attributes {dimension_semantics = [#tpu.dimension_semantics<parallel>, #tpu.dimension_semantics<arbitrary>], iteration_bounds = array<i64: 1, 1>, scalar_prefetch = 0 : i64, scratch_operands = 1 : i64, tpu.core_type = #tpu.core_type<tc>, window_params = [{transform_indices = @transform_0, window_bounds = array<i64: 16, 128>}, {pipeline_mode = #tpu.pipeline_mode<synchronous>, transform_indices = @transform_1, window_bounds = array<i64: 128, 128>}, {pipeline_mode = #tpu.pipeline_mode<synchronous>, transform_indices = @transform_2, window_bounds = array<i64: 1, 128>}, {pipeline_mode = #tpu.pipeline_mode<synchronous>, transform_indices = @transform_3, window_bounds = array<i64: 128, 128>}, {pipeline_mode = #tpu.pipeline_mode<synchronous>, transform_indices = @transform_4, window_bounds = array<i64: 1, 128>}, {transform_indices = @transform_5, window_bounds = array<i64: 16, 128>}]} {
    %c0 = arith.constant 0 : index
    %c0_0 = arith.constant 0 : index
    %0 = vector.load %arg2[%c0, %c0_0] : memref<16x128xf32, #tpu.memory_space<vmem>>, vector<16x128xf32>
    %c0_i32 = arith.constant 0 : i32
    %1 = arith.cmpi eq, %arg1, %c0_i32 : i32
    %2 = arith.extui %1 : i1 to i32
    %c0_i32_1 = arith.constant 0 : i32
    %3 = arith.cmpi ne, %2, %c0_i32_1 : i32
    scf.if %3 {
      %c0_16 = arith.constant 0 : index
      %c0_17 = arith.constant 0 : index
      %21 = vector.load %arg6[%c0_16, %c0_17] : memref<1x128xf32, #tpu.memory_space<vmem>>, vector<1x128xf32>
      %22 = vector.broadcast %21 : vector<1x128xf32> to vector<16x128xf32>
      %23 = arith.addf %0, %22 : vector<16x128xf32>
      %c0_18 = arith.constant 0 : index
      %c0_19 = arith.constant 0 : index
      %24 = vector.load %arg8[%c0_18, %c0_19] : memref<16x128xf32, #tpu.memory_space<vmem>>, vector<16x128xf32>
      tpu.vector_store %arg8[%c0_18, %c0_19], %23 {strides = array<i32>} : memref<16x128xf32, #tpu.memory_space<vmem>>, vector<16x128xf32>,
    } else {
    }
    %4 = arith.truncf %0 : vector<16x128xf32> to vector<16x128xbf16>
    %c0_2 = arith.constant 0 : index
    %c0_3 = arith.constant 0 : index
    %5 = vector.load %arg3[%c0_2, %c0_3] : memref<128x128xbf16, #tpu.memory_space<vmem>>, vector<128x128xbf16>
    %cst = arith.constant dense<0.000000e+00> : vector<16x128xf32>
    %6 = tpu.matmul %4, %5, %cst {dimension_numbers = #tpu.dot_dimension_numbers<[1], [0], [0], [1], [0, 0, 1, 1], [], []>} : vector<16x128xbf16>, vector<128x128xbf16>, vector<16x128xf32> -> vector<16x128xf32>
    %c0_4 = arith.constant 0 : index
    %c0_5 = arith.constant 0 : index
    %7 = vector.load %arg4[%c0_4, %c0_5] : memref<1x128xf32, #tpu.memory_space<vmem>>, vector<1x128xf32>
    %8 = vector.broadcast %7 : vector<1x128xf32> to vector<16x128xf32>
    %9 = arith.addf %6, %8 : vector<16x128xf32>
    %cst_6 = arith.constant 0.000000e+00 : f32
    %10 = vector.broadcast %cst_6 : f32 to vector<16x128xf32>
    %11 = arith.maximumf %9, %10 : vector<16x128xf32>
    %c0_7 = arith.constant 0 : index
    %c0_8 = arith.constant 0 : index
    %12 = vector.load %arg8[%c0_7, %c0_8] : memref<16x128xf32, #tpu.memory_space<vmem>>, vector<16x128xf32>
    %13 = arith.truncf %11 : vector<16x128xf32> to vector<16x128xbf16>
    %c0_9 = arith.constant 0 : index
    %c0_10 = arith.constant 0 : index
    %14 = vector.load %arg5[%c0_9, %c0_10] : memref<128x128xbf16, #tpu.memory_space<vmem>>, vector<128x128xbf16>
    %cst_11 = arith.constant dense<0.000000e+00> : vector<16x128xf32>
    %15 = tpu.matmul %13, %14, %cst_11 {dimension_numbers = #tpu.dot_dimension_numbers<[1], [0], [0], [1], [0, 0, 1, 1], [], []>} : vector<16x128xbf16>, vector<128x128xbf16>, vector<16x128xf32> -> vector<16x128xf32>
    %16 = arith.addf %12, %15 : vector<16x128xf32>
    %c0_12 = arith.constant 0 : index
    %c0_13 = arith.constant 0 : index
    %17 = vector.load %arg8[%c0_12, %c0_13] : memref<16x128xf32, #tpu.memory_space<vmem>>, vector<16x128xf32>
    tpu.vector_store %arg8[%c0_12, %c0_13], %16 {strides = array<i32>} : memref<16x128xf32, #tpu.memory_space<vmem>>, vector<16x128xf32>,
    %c0_i32_14 = arith.constant 0 : i32
    %18 = arith.cmpi eq, %arg1, %c0_i32_14 : i32
    %19 = arith.extui %18 : i1 to i32
    %c0_i32_15 = arith.constant 0 : i32
    %20 = arith.cmpi ne, %19, %c0_i32_15 : i32
    scf.if %20 {
      %c0_16 = arith.constant 0 : index
      %c0_17 = arith.constant 0 : index
      %21 = vector.load %arg8[%c0_16, %c0_17] : memref<16x128xf32, #tpu.memory_space<vmem>>, vector<16x128xf32>
      %c0_18 = arith.constant 0 : index
      %c0_19 = arith.constant 0 : index
      %22 = vector.load %arg7[%c0_18, %c0_19] : memref<16x128xf32, #tpu.memory_space<vmem>>, vector<16x128xf32>
      tpu.vector_store %arg7[%c0_18, %c0_19], %21 {strides = array<i32>} : memref<16x128xf32, #tpu.memory_space<vmem>>, vector<16x128xf32>,
    } else {
    }
    return
  }
  func.func @transform_0(%arg0: i32, %arg1: i32) -> (i32, i32) {
    %c0_i32 = arith.constant 0 : i32
    %c0_i32_0 = arith.constant 0 : i32
    return %arg0, %c0_i32 : i32, i32
  }
  func.func @transform_1(%arg0: i32, %arg1: i32) -> (i32, i32) {
    %c0_i32 = arith.constant 0 : i32
    %c0_i32_0 = arith.constant 0 : i32
    return %c0_i32, %arg1 : i32, i32
  }
  func.func @transform_2(%arg0: i32, %arg1: i32) -> (i32, i32) {
    %c0_i32 = arith.constant 0 : i32
    %c0_i32_0 = arith.constant 0 : i32
    return %c0_i32, %arg1 : i32, i32
  }
  func.func @transform_3(%arg0: i32, %arg1: i32) -> (i32, i32) {
    %c0_i32 = arith.constant 0 : i32
    %c0_i32_0 = arith.constant 0 : i32
    return %arg1, %c0_i32 : i32, i32
  }
  func.func @transform_4(%arg0: i32, %arg1: i32) -> (i32, i32) {
    %c0_i32 = arith.constant 0 : i32
    %c0_i32_0 = arith.constant 0 : i32
    %c0_i32_1 = arith.constant 0 : i32
    return %c0_i32, %c0_i32_0 : i32, i32
  }
  func.func @transform_5(%arg0: i32, %arg1: i32) -> (i32, i32) {
    %c0_i32 = arith.constant 0 : i32
    %c0_i32_0 = arith.constant 0 : i32
    return %arg0, %c0_i32 : i32, i32
  }
}

module attributes {stable_mosaic.version = 11 : i64} {
  func.func @_resmlp_kernel(%arg0: i32, %arg1: i32, %arg2: memref<16x128xf32, #tpu.memory_space<vmem>>, %arg3: memref<128x128xbf16, #tpu.memory_space<vmem>>, %arg4: memref<1x128xf32, #tpu.memory_space<vmem>>, %arg5: memref<128x128xbf16, #tpu.memory_space<vmem>>, %arg6: memref<1x128xf32, #tpu.memory_space<vmem>>, %arg7: memref<16x128xf32, #tpu.memory_space<vmem>>, %arg8: memref<16x128xf32, #tpu.memory_space<vmem>>) attributes {dimension_semantics = [#tpu.dimension_semantics<parallel>, #tpu.dimension_semantics<arbitrary>], iteration_bounds = array<i64: 1, 1>, scalar_prefetch = 0 : i64, scratch_operands = 1 : i64, tpu.core_type = #tpu.core_type<tc>, window_params = [{transform_indices = @transform_0, window_bounds = array<i64: 16, 128>}, {transform_indices = @transform_1, window_bounds = array<i64: 128, 128>}, {transform_indices = @transform_2, window_bounds = array<i64: 1, 128>}, {transform_indices = @transform_3, window_bounds = array<i64: 128, 128>}, {pipeline_mode = #tpu.pipeline_mode<synchronous>, transform_indices = @transform_4, window_bounds = array<i64: 1, 128>}, {transform_indices = @transform_5, window_bounds = array<i64: 16, 128>}]} {
    %c0 = arith.constant 0 : index
    %c0_0 = arith.constant 0 : index
    %0 = vector.load %arg2[%c0, %c0_0] : memref<16x128xf32, #tpu.memory_space<vmem>>, vector<16x128xf32>
    %c0_i32 = arith.constant 0 : i32
    %1 = arith.cmpi eq, %arg1, %c0_i32 : i32
    %2 = arith.extui %1 : i1 to i32
    %c0_i32_1 = arith.constant 0 : i32
    %3 = arith.cmpi ne, %2, %c0_i32_1 : i32
    scf.if %3 {
      %c0_16 = arith.constant 0 : index
      %c0_17 = arith.constant 0 : index
      %21 = vector.load %arg6[%c0_16, %c0_17] : memref<1x128xf32, #tpu.memory_space<vmem>>, vector<1x128xf32>
      %22 = vector.broadcast %21 : vector<1x128xf32> to vector<16x128xf32>
      %23 = arith.addf %0, %22 : vector<16x128xf32>
      %c0_18 = arith.constant 0 : index
      %c0_19 = arith.constant 0 : index
      %24 = vector.load %arg8[%c0_18, %c0_19] : memref<16x128xf32, #tpu.memory_space<vmem>>, vector<16x128xf32>
      tpu.vector_store %arg8[%c0_18, %c0_19], %23 {strides = array<i32>} : memref<16x128xf32, #tpu.memory_space<vmem>>, vector<16x128xf32>,
    } else {
    }
    %4 = arith.truncf %0 : vector<16x128xf32> to vector<16x128xbf16>
    %c0_2 = arith.constant 0 : index
    %c0_3 = arith.constant 0 : index
    %5 = vector.load %arg3[%c0_2, %c0_3] : memref<128x128xbf16, #tpu.memory_space<vmem>>, vector<128x128xbf16>
    %cst = arith.constant dense<0.000000e+00> : vector<16x128xf32>
    %6 = tpu.matmul %4, %5, %cst {dimension_numbers = #tpu.dot_dimension_numbers<[1], [0], [0], [1], [0, 0, 1, 1], [], []>} : vector<16x128xbf16>, vector<128x128xbf16>, vector<16x128xf32> -> vector<16x128xf32>
    %c0_4 = arith.constant 0 : index
    %c0_5 = arith.constant 0 : index
    %7 = vector.load %arg4[%c0_4, %c0_5] : memref<1x128xf32, #tpu.memory_space<vmem>>, vector<1x128xf32>
    %8 = vector.broadcast %7 : vector<1x128xf32> to vector<16x128xf32>
    %9 = arith.addf %6, %8 : vector<16x128xf32>
    %cst_6 = arith.constant 0.000000e+00 : f32
    %10 = vector.broadcast %cst_6 : f32 to vector<16x128xf32>
    %11 = arith.maximumf %9, %10 : vector<16x128xf32>
    %c0_7 = arith.constant 0 : index
    %c0_8 = arith.constant 0 : index
    %12 = vector.load %arg8[%c0_7, %c0_8] : memref<16x128xf32, #tpu.memory_space<vmem>>, vector<16x128xf32>
    %13 = arith.truncf %11 : vector<16x128xf32> to vector<16x128xbf16>
    %c0_9 = arith.constant 0 : index
    %c0_10 = arith.constant 0 : index
    %14 = vector.load %arg5[%c0_9, %c0_10] : memref<128x128xbf16, #tpu.memory_space<vmem>>, vector<128x128xbf16>
    %cst_11 = arith.constant dense<0.000000e+00> : vector<16x128xf32>
    %15 = tpu.matmul %13, %14, %cst_11 {dimension_numbers = #tpu.dot_dimension_numbers<[1], [0], [0], [1], [0, 0, 1, 1], [], []>} : vector<16x128xbf16>, vector<128x128xbf16>, vector<16x128xf32> -> vector<16x128xf32>
    %16 = arith.addf %12, %15 : vector<16x128xf32>
    %c0_12 = arith.constant 0 : index
    %c0_13 = arith.constant 0 : index
    %17 = vector.load %arg8[%c0_12, %c0_13] : memref<16x128xf32, #tpu.memory_space<vmem>>, vector<16x128xf32>
    tpu.vector_store %arg8[%c0_12, %c0_13], %16 {strides = array<i32>} : memref<16x128xf32, #tpu.memory_space<vmem>>, vector<16x128xf32>,
    %c0_i32_14 = arith.constant 0 : i32
    %18 = arith.cmpi eq, %arg1, %c0_i32_14 : i32
    %19 = arith.extui %18 : i1 to i32
    %c0_i32_15 = arith.constant 0 : i32
    %20 = arith.cmpi ne, %19, %c0_i32_15 : i32
    scf.if %20 {
      %c0_16 = arith.constant 0 : index
      %c0_17 = arith.constant 0 : index
      %21 = vector.load %arg8[%c0_16, %c0_17] : memref<16x128xf32, #tpu.memory_space<vmem>>, vector<16x128xf32>
      %c0_18 = arith.constant 0 : index
      %c0_19 = arith.constant 0 : index
      %22 = vector.load %arg7[%c0_18, %c0_19] : memref<16x128xf32, #tpu.memory_space<vmem>>, vector<16x128xf32>
      tpu.vector_store %arg7[%c0_18, %c0_19], %21 {strides = array<i32>} : memref<16x128xf32, #tpu.memory_space<vmem>>, vector<16x128xf32>,
    } else {
    }
    return
  }
  func.func @transform_0(%arg0: i32, %arg1: i32) -> (i32, i32) {
    %c0_i32 = arith.constant 0 : i32
    %c0_i32_0 = arith.constant 0 : i32
    return %arg0, %c0_i32 : i32, i32
  }
  func.func @transform_1(%arg0: i32, %arg1: i32) -> (i32, i32) {
    %c0_i32 = arith.constant 0 : i32
    %c0_i32_0 = arith.constant 0 : i32
    return %c0_i32, %arg1 : i32, i32
  }
  func.func @transform_2(%arg0: i32, %arg1: i32) -> (i32, i32) {
    %c0_i32 = arith.constant 0 : i32
    %c0_i32_0 = arith.constant 0 : i32
    return %c0_i32, %arg1 : i32, i32
  }
  func.func @transform_3(%arg0: i32, %arg1: i32) -> (i32, i32) {
    %c0_i32 = arith.constant 0 : i32
    %c0_i32_0 = arith.constant 0 : i32
    return %arg1, %c0_i32 : i32, i32
  }
  func.func @transform_4(%arg0: i32, %arg1: i32) -> (i32, i32) {
    %c0_i32 = arith.constant 0 : i32
    %c0_i32_0 = arith.constant 0 : i32
    %c0_i32_1 = arith.constant 0 : i32
    return %c0_i32, %c0_i32_0 : i32, i32
  }
  func.func @transform_5(%arg0: i32, %arg1: i32) -> (i32, i32) {
    %c0_i32 = arith.constant 0 : i32
    %c0_i32_0 = arith.constant 0 : i32
    return %arg0, %c0_i32 : i32, i32
  }
}

</mosaic_0001>

<bundles_post_ra>
// kernel: tpu_custom_call.1
= control target key start
LH: loop header
LB: loop body
LE: loop exit
PB: predicated region body
PF: predicated region fallthrough
CT: control target
= control target key end

     0   :  { %10 = vsyncpa [#allocation4], 0  ;;  %s533_s0 = inlined_call_operand.hbm [shape: f32[16,128], index: 0, kind: input, shape index: {}]   ;;  %s534_s1 = inlined_call_operand.hbm [shape: bf16[128,128], index: 1, kind: input, shape index: {}]   ;;  %s535_s2 = inlined_call_operand.vmem [shape: f32[1,128], index: 2, kind: input, shape index: {}]   ;;  %s536_s3 = inlined_call_operand.hbm [shape: bf16[128,128], index: 3, kind: input, shape index: {}]   ;;  %s537_s4 = inlined_call_operand.vmem [shape: f32[1,128], index: 4, kind: input, shape index: {}]   ;;  %s538_s5 = inlined_call_operand.hbm [shape: f32[16,128], index: 5, kind: output, shape index: {}]  }
   0x1   :  { %11 = vsyncpa [#allocation7], 0  ;;  %s30_s20 = sshll.u32 %s534_s1, 4  ;;  %s31_s20 = int_to_ptr.hbm [resolvable:$true] %s30_s20 }
   0x2   :  { %12 = vsyncpa [#allocation5], 0  ;;  %s471_s21 = smov [#allocation6]   ;;  %s17_s25 = sshll.u32 %s533_s0, 4  ;;  %s18_s25 = int_to_ptr.hbm [resolvable:$true] %s17_s25 }
   0x3   :  { %s32_s22 = sshll.u32 %s471_s21, 4  ;;  %s472_s26 = smov 64   ;;  %s33_s22 = int_to_ptr.vmem [resolvable:$true] %s32_s22 }
   0x4   :  { %s473_s27 = smov 4   ;;  %s474_s28 = smov [#allocation3]  }
   0x5   :  { %38 = dma.hbm_to_vmem [thread:$0]  %s31_s20, 1024, %s33_s22, [#allocation7], %s472_s26, %s472_s26, %s473_s27  }
   0x6   :  { %s19_s29 = sshll.u32 %s474_s28, 4  ;;  %s475_s30 = smov 128   ;;  %s20_s29 = int_to_ptr.vmem [resolvable:$true] %s19_s29 }
   0x7   :  { %s476_s6 = smov 8   ;;  %s45_s8 = sshll.u32 %s536_s3, 4  ;;  %s46_s8 = int_to_ptr.hbm [resolvable:$true] %s45_s8 }
   0x8   :  { %25 = dma.hbm_to_vmem [thread:$0]  %s18_s25, 256, %s20_s29, [#allocation4], %s475_s30, %s475_s30, %s476_s6  }
   0x9   :  { %s477_s9 = smov [#allocation8]  }
   0xa   :  { %s47_s0 = sshll.u32 %s477_s9, 4  ;;  %s48_s0 = int_to_ptr.vmem [resolvable:$true] %s47_s0 }
   0xb   :  { %53 = dma.hbm_to_vmem [thread:$0]  %s46_s8, 1024, %s48_s0, [#allocation7], %s472_s26, %s472_s26, %s473_s27  }
   0xc   :  { %465 = dma.done.wait [#allocation4], 256  }
   0xd   :  { %466 = vsyncadd [#allocation4], 4294967040 }
   0xe   :  { %467 = dma.done.wait [#allocation7], 2048  }
   0xf   :  { %468 = vsyncadd [#allocation7], 4294965248  ;;  %v350_v0 = vld [vmem:[#allocation6 + $0x38] sm:$0xff]  ;;  %v349_v1 = vld [vmem:[#allocation6 + $0x30] sm:$0xff]  ;;  %s478_s13 = smov [#allocation9]   ;;  %s265_s16 = sshll.u32 %s538_s5, 4  ;;  %s266_s16 = int_to_ptr.hbm [resolvable:$true] %s265_s16 }
  0x10   :  { %151 = vmatpush.bf16.msra.mxu0 %v350_v0  ;;  %v358_v2 = vld [vmem:[#allocation8 + $0x38] sm:$0xff]  ;;  %v357_v3 = vld [vmem:[#allocation8 + $0x30] sm:$0xff]  ;;  %v348_v4 = vld [vmem:[#allocation6 + $0x28] sm:$0xff]  ;;  %s263_s14 = sshll.u32 %s478_s13, 4  ;;  %s264_s14 = int_to_ptr.vmem [resolvable:$true] %s263_s14 }
  0x11   :  { %234 = vmatpush.bf16.msra.mxu1 %v358_v2  ;;  %v356_v5 = vld [vmem:[#allocation8 + $0x28] sm:$0xff]  ;;  %v347_v6 = vld [vmem:[#allocation6 + $0x20] sm:$0xff]  ;;  %v346_v8 = vld [vmem:[#allocation6 + $0x18] sm:$0xff] }
  0x12   :  { %v355_v7 = vld [vmem:[#allocation8 + $0x20] sm:$0xff]  ;;  %v345_v9 = vld [vmem:[#allocation6 + $0x10] sm:$0xff]  ;;  %v344_v10 = vld [vmem:[#allocation6 + $0x8] sm:$0xff] }
  0x13   :  { %v343_v11 = vld [vmem:[#allocation6] sm:$0xff]  ;;  %v68_v12 = vld [vmem:[#allocation3] sm:$0xff]  ;;  %v69_v13 = vld [vmem:[#allocation3 + $0x8] sm:$0xff] }
  0x14   :  { %152 = vmatpush.bf16.msra.mxu0 %v349_v1  ;;  %v82_v14 = vpack.c.bf16 %v69_v13, %v68_v12  ;;  %v354_v15 = vld [vmem:[#allocation8 + $0x18] sm:$0xff]  ;;  %v353_v16 = vld [vmem:[#allocation8 + $0x10] sm:$0xff]  ;;  %v352_v17 = vld [vmem:[#allocation8 + $0x8] sm:$0xff] }
  0x15   :  { %235 = vmatpush.bf16.msra.mxu1 %v357_v3  ;;  %v351_v18 = vld [vmem:[#allocation8] sm:$0xff]  ;;  %v367_v20 = vld [vmem:[%s535_s2] ss:$0 sm:$0xff] }
  0x16   :  { %v368_v27 = vld [vmem:[%s537_s4] ss:$0 sm:$0xff] }
  0x17   :  { %v78_v28 = vadd.f32 %v368_v27, %v68_v12  ;;  %v79_v31 = vadd.f32 %v368_v27, %v69_v13 }
  0x18   :  { %153 = vmatpush.bf16.msra.mxu0 %v348_v4 }
  0x19   :  { %236 = vmatpush.bf16.msra.mxu1 %v356_v5 }
  0x1c   :  { %154 = vmatpush.bf16.msra.mxu0 %v347_v6 }
  0x1d   :  { %237 = vmatpush.bf16.msra.mxu1 %v355_v7 }
  0x20   :  { %155 = vmatpush.bf16.msra.mxu0 %v346_v8 }
  0x21   :  { %238 = vmatpush.bf16.msra.mxu1 %v354_v15 }
  0x24   :  { %156 = vmatpush.bf16.msra.mxu0 %v345_v9 }
  0x25   :  { %239 = vmatpush.bf16.msra.mxu1 %v353_v16 }
  0x28   :  { %157 = vmatpush.bf16.msra.mxu0 %v344_v10 }
  0x29   :  { %240 = vmatpush.bf16.msra.mxu1 %v352_v17 }
  0x2c   :  { %158 = vmatpush.bf16.msra.mxu0 %v343_v11 }
  0x2d   :  { %241 = vmatpush.bf16.msra.mxu1 %v351_v18 }
  0x2f   :  { %159 = vmatmul.bf16.vlgmr.msra.gmra.mxu0 %v82_v14 }
  0xac   :  { %v160_v19 = vpop.f32.mrf.mxu0 }
  0xad   :  { %v161_v21 = vadd.f32 %v367_v20, %v160_v19 }
  0xaf   :  { %v165_v24 = vmax.f32 %v161_v21, 0.0 }
  0xb4   :  { %v162_v22 = vpop.f32.mrf.mxu0 }
  0xb5   :  { %v163_v23 = vadd.f32 %v367_v20, %v162_v22 }
  0xb7   :  { %v166_v25 = vmax.f32 %v163_v23, 0.0 }
  0xb9   :  { %v169_v26 = vpack.c.bf16 %v166_v25, %v165_v24 }
  0xbb   :  { %242 = vmatmul.bf16.vlgmr.msra.gmra.mxu1 %v169_v26 }
 0x138   :  { %v243_v29 = vpop.f32.mrf.mxu1 }
 0x139   :  { %v248_v30 = vadd.f32 %v243_v29, %v78_v28 }
 0x13b   :  { %257 = vst [vmem:[#allocation9] sm:$0xff] %v248_v30 }
 0x140   :  { %v245_v32 = vpop.f32.mrf.mxu1 }
 0x141   :  { %v249_v33 = vadd.f32 %v245_v32, %v79_v31 }
 0x143   :  { %258 = vst [vmem:[#allocation9 + $0x8] sm:$0xff] %v249_v33 }
 0x144   :  { %271 = dma.vmem_to_hbm [thread:$0]  %s264_s14, 256, %s266_s16, [#allocation5], %s475_s30, %s475_s30, %s476_s6  }
 0x145   :  { %469 = dma.done.wait [#allocation5], 256  }
 0x146   :  { %470 = vsyncadd [#allocation5], 4294967040 }
 0x147   :  { %276 = vsyncpa [#allocation4], 1 }
 0x148   :  { %277 = vsyncpa [#allocation7], 1 }
 0x149   :  { %278 = vsyncpa [#allocation5], 1 }

// kernel: tpu_custom_call.1
= control target key start
LH: loop header
LB: loop body
LE: loop exit
PB: predicated region body
PF: predicated region fallthrough
CT: control target
= control target key end

     0   :  { %10 = vsyncpa [#allocation4], 0  ;;  %s533_s0 = inlined_call_operand.hbm [shape: f32[16,128], index: 0, kind: input, shape index: {}]   ;;  %s534_s1 = inlined_call_operand.hbm [shape: bf16[128,128], index: 1, kind: input, shape index: {}]   ;;  %s535_s2 = inlined_call_operand.vmem [shape: f32[1,128], index: 2, kind: input, shape index: {}]   ;;  %s536_s3 = inlined_call_operand.hbm [shape: bf16[128,128], index: 3, kind: input, shape index: {}]   ;;  %s537_s4 = inlined_call_operand.vmem [shape: f32[1,128], index: 4, kind: input, shape index: {}]   ;;  %s538_s5 = inlined_call_operand.hbm [shape: f32[16,128], index: 5, kind: output, shape index: {}]  }
   0x1   :  { %11 = vsyncpa [#allocation7], 0  ;;  %s30_s20 = sshll.u32 %s534_s1, 4  ;;  %s31_s20 = int_to_ptr.hbm [resolvable:$true] %s30_s20 }
   0x2   :  { %12 = vsyncpa [#allocation5], 0  ;;  %s471_s21 = smov [#allocation6]   ;;  %s17_s25 = sshll.u32 %s533_s0, 4  ;;  %s18_s25 = int_to_ptr.hbm [resolvable:$true] %s17_s25 }
   0x3   :  { %s32_s22 = sshll.u32 %s471_s21, 4  ;;  %s472_s26 = smov 64   ;;  %s33_s22 = int_to_ptr.vmem [resolvable:$true] %s32_s22 }
   0x4   :  { %s473_s27 = smov 4   ;;  %s474_s28 = smov [#allocation3]  }
   0x5   :  { %38 = dma.hbm_to_vmem [thread:$0]  %s31_s20, 1024, %s33_s22, [#allocation7], %s472_s26, %s472_s26, %s473_s27  }
   0x6   :  { %s19_s29 = sshll.u32 %s474_s28, 4  ;;  %s475_s30 = smov 128   ;;  %s20_s29 = int_to_ptr.vmem [resolvable:$true] %s19_s29 }
   0x7   :  { %s476_s6 = smov 8   ;;  %s45_s8 = sshll.u32 %s536_s3, 4  ;;  %s46_s8 = int_to_ptr.hbm [resolvable:$true] %s45_s8 }
   0x8   :  { %25 = dma.hbm_to_vmem [thread:$0]  %s18_s25, 256, %s20_s29, [#allocation4], %s475_s30, %s475_s30, %s476_s6  }
   0x9   :  { %s477_s9 = smov [#allocation8]  }
   0xa   :  { %s47_s0 = sshll.u32 %s477_s9, 4  ;;  %s48_s0 = int_to_ptr.vmem [resolvable:$true] %s47_s0 }
   0xb   :  { %53 = dma.hbm_to_vmem [thread:$0]  %s46_s8, 1024, %s48_s0, [#allocation7], %s472_s26, %s472_s26, %s473_s27  }
   0xc   :  { %465 = dma.done.wait [#allocation4], 256  }
   0xd   :  { %466 = vsyncadd [#allocation4], 4294967040 }
   0xe   :  { %467 = dma.done.wait [#allocation7], 2048  }
   0xf   :  { %468 = vsyncadd [#allocation7], 4294965248  ;;  %v350_v0 = vld [vmem:[#allocation6 + $0x38] sm:$0xff]  ;;  %v349_v1 = vld [vmem:[#allocation6 + $0x30] sm:$0xff]  ;;  %s478_s13 = smov [#allocation9]   ;;  %s265_s16 = sshll.u32 %s538_s5, 4  ;;  %s266_s16 = int_to_ptr.hbm [resolvable:$true] %s265_s16 }
  0x10   :  { %151 = vmatpush.bf16.msra.mxu0 %v350_v0  ;;  %v358_v2 = vld [vmem:[#allocation8 + $0x38] sm:$0xff]  ;;  %v357_v3 = vld [vmem:[#allocation8 + $0x30] sm:$0xff]  ;;  %v348_v4 = vld [vmem:[#allocation6 + $0x28] sm:$0xff]  ;;  %s263_s14 = sshll.u32 %s478_s13, 4  ;;  %s264_s14 = int_to_ptr.vmem [resolvable:$true] %s263_s14 }
  0x11   :  { %234 = vmatpush.bf16.msra.mxu1 %v358_v2  ;;  %v356_v5 = vld [vmem:[#allocation8 + $0x28] sm:$0xff]  ;;  %v347_v6 = vld [vmem:[#allocation6 + $0x20] sm:$0xff]  ;;  %v346_v8 = vld [vmem:[#allocation6 + $0x18] sm:$0xff] }
  0x12   :  { %v355_v7 = vld [vmem:[#allocation8 + $0x20] sm:$0xff]  ;;  %v345_v9 = vld [vmem:[#allocation6 + $0x10] sm:$0xff]  ;;  %v344_v10 = vld [vmem:[#allocation6 + $0x8] sm:$0xff] }
  0x13   :  { %v343_v11 = vld [vmem:[#allocation6] sm:$0xff]  ;;  %v68_v12 = vld [vmem:[#allocation3] sm:$0xff]  ;;  %v69_v13 = vld [vmem:[#allocation3 + $0x8] sm:$0xff] }
  0x14   :  { %152 = vmatpush.bf16.msra.mxu0 %v349_v1  ;;  %v82_v14 = vpack.c.bf16 %v69_v13, %v68_v12  ;;  %v354_v15 = vld [vmem:[#allocation8 + $0x18] sm:$0xff]  ;;  %v353_v16 = vld [vmem:[#allocation8 + $0x10] sm:$0xff]  ;;  %v352_v17 = vld [vmem:[#allocation8 + $0x8] sm:$0xff] }
  0x15   :  { %235 = vmatpush.bf16.msra.mxu1 %v357_v3  ;;  %v351_v18 = vld [vmem:[#allocation8] sm:$0xff]  ;;  %v367_v20 = vld [vmem:[%s535_s2] ss:$0 sm:$0xff] }
  0x16   :  { %v368_v27 = vld [vmem:[%s537_s4] ss:$0 sm:$0xff] }
  0x17   :  { %v78_v28 = vadd.f32 %v368_v27, %v68_v12  ;;  %v79_v31 = vadd.f32 %v368_v27, %v69_v13 }
  0x18   :  { %153 = vmatpush.bf16.msra.mxu0 %v348_v4 }
  0x19   :  { %236 = vmatpush.bf16.msra.mxu1 %v356_v5 }
  0x1c   :  { %154 = vmatpush.bf16.msra.mxu0 %v347_v6 }
  0x1d   :  { %237 = vmatpush.bf16.msra.mxu1 %v355_v7 }
  0x20   :  { %155 = vmatpush.bf16.msra.mxu0 %v346_v8 }
  0x21   :  { %238 = vmatpush.bf16.msra.mxu1 %v354_v15 }
  0x24   :  { %156 = vmatpush.bf16.msra.mxu0 %v345_v9 }
  0x25   :  { %239 = vmatpush.bf16.msra.mxu1 %v353_v16 }
  0x28   :  { %157 = vmatpush.bf16.msra.mxu0 %v344_v10 }
  0x29   :  { %240 = vmatpush.bf16.msra.mxu1 %v352_v17 }
  0x2c   :  { %158 = vmatpush.bf16.msra.mxu0 %v343_v11 }
  0x2d   :  { %241 = vmatpush.bf16.msra.mxu1 %v351_v18 }
  0x2f   :  { %159 = vmatmul.bf16.vlgmr.msra.gmra.mxu0 %v82_v14 }
  0xac   :  { %v160_v19 = vpop.f32.mrf.mxu0 }
  0xad   :  { %v161_v21 = vadd.f32 %v367_v20, %v160_v19 }
  0xaf   :  { %v165_v24 = vmax.f32 %v161_v21, 0.0 }
  0xb4   :  { %v162_v22 = vpop.f32.mrf.mxu0 }
  0xb5   :  { %v163_v23 = vadd.f32 %v367_v20, %v162_v22 }
  0xb7   :  { %v166_v25 = vmax.f32 %v163_v23, 0.0 }
  0xb9   :  { %v169_v26 = vpack.c.bf16 %v166_v25, %v165_v24 }
  0xbb   :  { %242 = vmatmul.bf16.vlgmr.msra.gmra.mxu1 %v169_v26 }
 0x138   :  { %v243_v29 = vpop.f32.mrf.mxu1 }
 0x139   :  { %v248_v30 = vadd.f32 %v243_v29, %v78_v28 }
 0x13b   :  { %257 = vst [vmem:[#allocation9] sm:$0xff] %v248_v30 }
 0x140   :  { %v245_v32 = vpop.f32.mrf.mxu1 }
 0x141   :  { %v249_v33 = vadd.f32 %v245_v32, %v79_v31 }
 0x143   :  { %258 = vst [vmem:[#allocation9 + $0x8] sm:$0xff] %v249_v33 }
 0x144   :  { %271 = dma.vmem_to_hbm [thread:$0]  %s264_s14, 256, %s266_s16, [#allocation5], %s475_s30, %s475_s30, %s476_s6  }
 0x145   :  { %469 = dma.done.wait [#allocation5], 256  }
 0x146   :  { %470 = vsyncadd [#allocation5], 4294967040 }
 0x147   :  { %276 = vsyncpa [#allocation4], 1 }
 0x148   :  { %277 = vsyncpa [#allocation7], 1 }
 0x149   :  { %278 = vsyncpa [#allocation5], 1 }

</bundles_post_ra>
